<compile_context>
chip_gen: v7x
topology: tpu7x:2x2x1
jax: 0.10.0
libtpu: 0.0.40
codegen_flags: <defaults>
</compile_context>

<pallas_src>
import functools

import jax
import jax.numpy as jnp
from jax import lax
from jax.experimental import pallas as pl
from jax.experimental.pallas import tpu as pltpu


def _round_down(x, m):
    return (x // m) * m


def _local_attention_kernel(x_ref, w_ref, o_ref, m_sc, l_sc, acc_sc,
                            *, seq_len, block_l, mask_l):
    """Process one (tb, tl, D) slab; online softmax over the L grid axis."""
    k = pl.program_id(1)

    @pl.when(k == 0)
    def _init():
        m_sc[...] = jnp.full_like(m_sc, -jnp.inf)
        l_sc[...] = jnp.zeros_like(l_sc)
        acc_sc[...] = jnp.zeros_like(acc_sc)

    x = x_ref[...]                                       # (tb, tl, D) f32
    tb, tl, d = x.shape

    if mask_l:
        # Ragged boundary L tile: zero out-of-range positions so they
        # contribute nothing (and never multiply possible garbage by 0*inf).
        lpos = k * block_l + lax.broadcasted_iota(jnp.int32, (tb, tl, 1), 1)
        valid = lpos < seq_len
        x = jnp.where(valid, x, 0.0)

    # Per-row "conv" score on the MXU (K = D contraction, N = 1).  The
    # (tb, tl) -> (tb*tl) collapse is layout-free because the wrapper keeps
    # tl a multiple of 8 (or tl == L).
    s = jnp.dot(x.reshape(tb * tl, d), w_ref[...],
                preferred_element_type=jnp.float32)      # (tb*tl, 1)
    s = s.reshape(tb, tl, 1)
    if mask_l:
        s = jnp.where(valid, s, -jnp.inf)

    # Online max-stabilized softmax update; the denominator is folded into
    # the epilogue so no (L, D)-wide divide is ever done.
    m_prev = m_sc[...]                                   # (tb, 1)
    m_new = jnp.maximum(m_prev, jnp.max(s, axis=1))      # (tb, 1)
    alpha = jnp.exp(m_prev - m_new)                      # (tb, 1)
    p = jnp.exp(s - m_new[:, None, :])                   # (tb, tl, 1), unnorm.
    l_sc[...] = alpha * l_sc[...] + jnp.sum(p, axis=1)   # (tb, 1)
    acc_sc[...] = alpha * acc_sc[...] + jnp.sum(x * p, axis=1)   # (tb, D)
    m_sc[...] = m_new

    @pl.when(k == pl.num_programs(1) - 1)
    def _finalize():
        inv = pl.reciprocal(l_sc[...], approx=True)      # EUP slot
        o_ref[...] = (acc_sc[...] * inv).astype(o_ref.dtype)


def _pick_tiles(B, L, D, target_bytes):
    """Pick (batch_tile, seq_tile): ~target_bytes per x slab, >=2 batch grid
    steps when B allows it (megacore), L tiled only when the slab is too big."""
    row_bytes = max(L * D * 4, 1)                        # one batch row of x
    if B < 8:
        tb = B                                           # full-extent block
    else:
        half = _round_down(B // 2, 8)
        tb_cap = half if half >= 8 else _round_down(B, 8)
        tb_fit = max(8, _round_down(target_bytes // row_bytes, 8))
        tb = max(8, min(tb_cap, tb_fit))
    if tb * row_bytes <= target_bytes or L <= 8:
        tl = L                                           # whole sequence
    else:
        tl = max(8, _round_down(target_bytes // (tb * D * 4), 8))
        tl = min(tl, _round_down(L, 8))                  # multiple of 8, <= L
    return tb, tl


def local_attention(x, w, b=None, *, block_b=None, block_l=None,
                    target_slab_bytes=8 << 20):
    """x: (B, L, D), w: (1, D) conv weight, b: (1,1) conv bias (ignored:
    softmax over L is invariant to a per-row constant shift). -> (B, D)."""
    B, L, D = x.shape
    x = x.astype(jnp.float32)
    w_col = w.astype(jnp.float32).reshape(D, 1)          # (D, 1) for MXU dot

    tb, tl = _pick_tiles(B, L, D, target_slab_bytes)
    if block_b is not None:
        tb = block_b
    if block_l is not None:
        tl = block_l
    n_b = pl.cdiv(B, tb)
    n_l = pl.cdiv(L, tl)
    mask_l = (L % tl) != 0

    kernel = functools.partial(_local_attention_kernel,
                               seq_len=L, block_l=tl, mask_l=mask_l)

    # Right-size scoped VMEM: x double-buffer + out + w + scratch + margin.
    need = (2 * tb * tl * D + 2 * tb * D + 2 * D + tb * (D + 2)) * 4
    vmem_limit = int(min(max(need + (2 << 20), 8 << 20), 32 << 20))

    out = pl.pallas_call(
        kernel,
        out_shape=jax.ShapeDtypeStruct((B, D), jnp.float32),
        grid_spec=pltpu.PrefetchScalarGridSpec(
            num_scalar_prefetch=0,
            grid=(n_b, n_l),
            in_specs=[
                pl.BlockSpec((tb, tl, D), lambda i, k: (i, k, 0)),  # x slab
                pl.BlockSpec((D, 1), lambda i, k: (0, 0)),          # weight
            ],
            out_specs=pl.BlockSpec((tb, D), lambda i, k: (i, 0)),   # acc block
            scratch_shapes=[
                pltpu.VMEM((tb, 1), jnp.float32),   # running max   m
                pltpu.VMEM((tb, 1), jnp.float32),   # running denom l
                pltpu.VMEM((tb, D), jnp.float32),   # running weighted sum
            ],
        ),
        compiler_params=pltpu.CompilerParams(
            dimension_semantics=("parallel", "arbitrary"),
            vmem_limit_bytes=vmem_limit,
        ),
    )(x, w_col)
    return out


def local_attention_ref(x, w, b):
    s = jnp.einsum("bld,d->bl", x, w[0]) + b[0, 0]        # conv score (+bias)
    scores = jax.nn.softmax(s, axis=1)                    # softmax over L
    return jnp.einsum("bld,bl->bd", x, scores)


if __name__ == "__main__":
    key = jax.random.PRNGKey(0)
    kx, kw, kb, kx2 = jax.random.split(key, 4)

    # Shapes implied by the module: bsz x max_vis_len x output_size.
    bsz, max_vis_len, output_size = 2, 8, 32
    x = jax.random.normal(kx, (bsz, max_vis_len, output_size), jnp.float32)
    w = jax.random.normal(kw, (1, output_size), jnp.float32) * 0.1
    b = jax.random.normal(kb, (1, 1), jnp.float32) * 0.1

    out = jax.block_until_ready(local_attention(x, w, b))
    ref = local_attention_ref(x, w, b)
    assert out.shape == (bsz, output_size)
    # approx reciprocal in the epilogue -> slightly looser tolerance.
    assert jnp.allclose(out, ref, atol=2e-3, rtol=2e-3), \
        float(jnp.max(jnp.abs(out - ref)))

    # Second case: exercises ragged batch (20 % 8 != 0), L tiling and the
    # masked online-softmax path (24 % 16 != 0).
    B2, L2, D2 = 20, 24, 32
    x2 = jax.random.normal(kx2, (B2, L2, D2), jnp.float32)
    out2 = jax.block_until_ready(local_attention(x2, w, b, block_b=8, block_l=16))
    ref2 = local_attention_ref(x2, w, b)
    assert out2.shape == (B2, D2)
    assert jnp.allclose(out2, ref2, atol=2e-3, rtol=2e-3), \
        float(jnp.max(jnp.abs(out2 - ref2)))

    print("KERNEL_OK")
</pallas_src>

<mosaic_0001>
module attributes {stable_mosaic.version = 11 : i64} {
  func.func @_local_attention_kernel(%arg0: i32, %arg1: i32, %arg2: memref<2x8x32xf32, #tpu.memory_space<vmem>>, %arg3: memref<32x1xf32, #tpu.memory_space<vmem>>, %arg4: memref<2x32xf32, #tpu.memory_space<vmem>>, %arg5: memref<2x1xf32, #tpu.memory_space<vmem>>, %arg6: memref<2x1xf32, #tpu.memory_space<vmem>>, %arg7: memref<2x32xf32, #tpu.memory_space<vmem>>) attributes {dimension_semantics = [#tpu.dimension_semantics<parallel>, #tpu.dimension_semantics<arbitrary>], iteration_bounds = array<i64: 1, 1>, scalar_prefetch = 0 : i64, scratch_operands = 3 : i64, tpu.core_type = #tpu.core_type<tc>, window_params = [{transform_indices = @transform_0, window_bounds = array<i64: 2, 8, 32>}, {pipeline_mode = #tpu.pipeline_mode<synchronous>, transform_indices = @transform_1, window_bounds = array<i64: 32, 1>}, {transform_indices = @transform_2, window_bounds = array<i64: 2, 32>}]} {
    %c0_i32 = arith.constant 0 : i32
    %0 = arith.cmpi eq, %arg1, %c0_i32 : i32
    %1 = arith.extui %0 : i1 to i32
    %c0_i32_0 = arith.constant 0 : i32
    %2 = arith.cmpi ne, %1, %c0_i32_0 : i32
    scf.if %2 {
      %cst_22 = arith.constant 0xFF800000 : f32
      %34 = vector.broadcast %cst_22 : f32 to vector<2x1xf32>
      %c0_23 = arith.constant 0 : index
      %c0_24 = arith.constant 0 : index
      %35 = vector.load %arg5[%c0_23, %c0_24] : memref<2x1xf32, #tpu.memory_space<vmem>>, vector<2x1xf32>
      tpu.vector_store %arg5[%c0_23, %c0_24], %34 {strides = array<i32>} : memref<2x1xf32, #tpu.memory_space<vmem>>, vector<2x1xf32>,
      %cst_25 = arith.constant 0.000000e+00 : f32
      %36 = vector.broadcast %cst_25 : f32 to vector<2x1xf32>
      %c0_26 = arith.constant 0 : index
      %c0_27 = arith.constant 0 : index
      %37 = vector.load %arg6[%c0_26, %c0_27] : memref<2x1xf32, #tpu.memory_space<vmem>>, vector<2x1xf32>
      tpu.vector_store %arg6[%c0_26, %c0_27], %36 {strides = array<i32>} : memref<2x1xf32, #tpu.memory_space<vmem>>, vector<2x1xf32>,
      %cst_28 = arith.constant 0.000000e+00 : f32
      %38 = vector.broadcast %cst_28 : f32 to vector<2x32xf32>
      %c0_29 = arith.constant 0 : index
      %c0_30 = arith.constant 0 : index
      %39 = vector.load %arg7[%c0_29, %c0_30] : memref<2x32xf32, #tpu.memory_space<vmem>>, vector<2x32xf32>
      tpu.vector_store %arg7[%c0_29, %c0_30], %38 {strides = array<i32>} : memref<2x32xf32, #tpu.memory_space<vmem>>, vector<2x32xf32>,
    } else {
    }
    %c0 = arith.constant 0 : index
    %c0_1 = arith.constant 0 : index
    %c0_2 = arith.constant 0 : index
    %3 = vector.load %arg2[%c0, %c0_1, %c0_2] : memref<2x8x32xf32, #tpu.memory_space<vmem>>, vector<2x8x32xf32>
    %4 = vector.shape_cast %3 : vector<2x8x32xf32> to vector<16x32xf32>
    %c0_3 = arith.constant 0 : index
    %c0_4 = arith.constant 0 : index
    %5 = vector.load %arg3[%c0_3, %c0_4] : memref<32x1xf32, #tpu.memory_space<vmem>>, vector<32x1xf32>
    %cst = arith.constant dense<0.000000e+00> : vector<16x1xf32>
    %6 = tpu.matmul %4, %5, %cst {dimension_numbers = #tpu.dot_dimension_numbers<[1], [0], [0], [1], [0, 0, 1, 1], [], []>} : vector<16x32xf32>, vector<32x1xf32>, vector<16x1xf32> -> vector<16x1xf32>
    %7 = vector.shape_cast %6 : vector<16x1xf32> to vector<2x8x1xf32>
    %c0_5 = arith.constant 0 : index
    %c0_6 = arith.constant 0 : index
    %8 = vector.load %arg5[%c0_5, %c0_6] : memref<2x1xf32, #tpu.memory_space<vmem>>, vector<2x1xf32>
    %cst_7 = arith.constant dense<0xFF800000> : vector<2x1xf32>
    %9 = vector.multi_reduction <maximumf>, %7, %cst_7 [1] : vector<2x8x1xf32> to vector<2x1xf32>
    %10 = arith.maximumf %8, %9 : vector<2x1xf32>
    %11 = arith.subf %8, %10 : vector<2x1xf32>
    %12 = math.exp %11 : vector<2x1xf32>
    %13 = vector.shape_cast %10 : vector<2x1xf32> to vector<2x1x1xf32>
    %14 = vector.broadcast %13 : vector<2x1x1xf32> to vector<2x8x1xf32>
    %15 = arith.subf %7, %14 : vector<2x8x1xf32>
    %16 = math.exp %15 : vector<2x8x1xf32>
    %c0_8 = arith.constant 0 : index
    %c0_9 = arith.constant 0 : index
    %17 = vector.load %arg6[%c0_8, %c0_9] : memref<2x1xf32, #tpu.memory_space<vmem>>, vector<2x1xf32>
    %18 = arith.mulf %12, %17 : vector<2x1xf32>
    %cst_10 = arith.constant dense<0.000000e+00> : vector<2x1xf32>
    %19 = vector.multi_reduction <add>, %16, %cst_10 [1] : vector<2x8x1xf32> to vector<2x1xf32>
    %20 = arith.addf %18, %19 : vector<2x1xf32>
    %c0_11 = arith.constant 0 : index
    %c0_12 = arith.constant 0 : index
    %21 = vector.load %arg6[%c0_11, %c0_12] : memref<2x1xf32, #tpu.memory_space<vmem>>, vector<2x1xf32>
    tpu.vector_store %arg6[%c0_11, %c0_12], %20 {strides = array<i32>} : memref<2x1xf32, #tpu.memory_space<vmem>>, vector<2x1xf32>,
    %c0_13 = arith.constant 0 : index
    %c0_14 = arith.constant 0 : index
    %22 = vector.load %arg7[%c0_13, %c0_14] : memref<2x32xf32, #tpu.memory_space<vmem>>, vector<2x32xf32>
    %23 = vector.broadcast %12 : vector<2x1xf32> to vector<2x32xf32>
    %24 = arith.mulf %23, %22 : vector<2x32xf32>
    %25 = vector.broadcast %16 : vector<2x8x1xf32> to vector<2x8x32xf32>
    %26 = arith.mulf %3, %25 : vector<2x8x32xf32>
    %cst_15 = arith.constant dense<0.000000e+00> : vector<2x32xf32>
    %27 = vector.multi_reduction <add>, %26, %cst_15 [1] : vector<2x8x32xf32> to vector<2x32xf32>
    %28 = arith.addf %24, %27 : vector<2x32xf32>
    %c0_16 = arith.constant 0 : index
    %c0_17 = arith.constant 0 : index
    %29 = vector.load %arg7[%c0_16, %c0_17] : memref<2x32xf32, #tpu.memory_space<vmem>>, vector<2x32xf32>
    tpu.vector_store %arg7[%c0_16, %c0_17], %28 {strides = array<i32>} : memref<2x32xf32, #tpu.memory_space<vmem>>, vector<2x32xf32>,
    %c0_18 = arith.constant 0 : index
    %c0_19 = arith.constant 0 : index
    %30 = vector.load %arg5[%c0_18, %c0_19] : memref<2x1xf32, #tpu.memory_space<vmem>>, vector<2x1xf32>
    tpu.vector_store %arg5[%c0_18, %c0_19], %10 {strides = array<i32>} : memref<2x1xf32, #tpu.memory_space<vmem>>, vector<2x1xf32>,
    %c0_i32_20 = arith.constant 0 : i32
    %31 = arith.cmpi eq, %arg1, %c0_i32_20 : i32
    %32 = arith.extui %31 : i1 to i32
    %c0_i32_21 = arith.constant 0 : i32
    %33 = arith.cmpi ne, %32, %c0_i32_21 : i32
    scf.if %33 {
      %c0_22 = arith.constant 0 : index
      %c0_23 = arith.constant 0 : index
      %34 = vector.load %arg6[%c0_22, %c0_23] : memref<2x1xf32, #tpu.memory_space<vmem>>, vector<2x1xf32>
      %35 = tpu.reciprocal %34 {approx = true} : vector<2x1xf32> -> vector<2x1xf32>
      %c0_24 = arith.constant 0 : index
      %c0_25 = arith.constant 0 : index
      %36 = vector.load %arg7[%c0_24, %c0_25] : memref<2x32xf32, #tpu.memory_space<vmem>>, vector<2x32xf32>
      %37 = vector.broadcast %35 : vector<2x1xf32> to vector<2x32xf32>
      %38 = arith.mulf %36, %37 : vector<2x32xf32>
      %c0_26 = arith.constant 0 : index
      %c0_27 = arith.constant 0 : index
      %39 = vector.load %arg4[%c0_26, %c0_27] : memref<2x32xf32, #tpu.memory_space<vmem>>, vector<2x32xf32>
      tpu.vector_store %arg4[%c0_26, %c0_27], %38 {strides = array<i32>} : memref<2x32xf32, #tpu.memory_space<vmem>>, vector<2x32xf32>,
    } else {
    }
    return
  }
  func.func @transform_0(%arg0: i32, %arg1: i32) -> (i32, i32, i32) {
    %c0_i32 = arith.constant 0 : i32
    %c0_i32_0 = arith.constant 0 : i32
    return %arg0, %arg1, %c0_i32 : i32, i32, i32
  }
  func.func @transform_1(%arg0: i32, %arg1: i32) -> (i32, i32) {
    %c0_i32 = arith.constant 0 : i32
    %c0_i32_0 = arith.constant 0 : i32
    %c0_i32_1 = arith.constant 0 : i32
    return %c0_i32, %c0_i32_0 : i32, i32
  }
  func.func @transform_2(%arg0: i32, %arg1: i32) -> (i32, i32) {
    %c0_i32 = arith.constant 0 : i32
    %c0_i32_0 = arith.constant 0 : i32
    return %arg0, %c0_i32 : i32, i32
  }
}

</mosaic_0001>

<bundles_post_ra>
// kernel: tpu_custom_call.1
= control target key start
LH: loop header
LB: loop body
LE: loop exit
PB: predicated region body
PF: predicated region fallthrough
CT: control target
= control target key end

     0   :  { %vm27_vm0 = vcmask 261120   ;;  %s406_s0 = inlined_call_operand.vmem [shape: f32[2,8,32], index: 0, kind: input, shape index: {}]   ;;  %s407_s1 = inlined_call_operand.vmem [shape: f32[32,1], index: 1, kind: input, shape index: {}]   ;;  %s408_s2 = inlined_call_operand.hbm [shape: f32[2,32], index: 2, kind: output, shape index: {}]  }
   0x1   :  { %v23_v0 = vld [vmem:[%s407_s1] sm:$0xff]  ;;  %v24_v1 = vld [vmem:[%s407_s1 + $0x8] sm:$0xff]  ;;  %v25_v2 = vld [vmem:[%s407_s1 + $0x10] sm:$0xff] }
   0x2   :  { %v283_v3 = vpack.c.bf16 %v24_v1, %v23_v0  ;;  %v26_v4 = vld [vmem:[%s407_s1 + $0x18] sm:$0xff]  ;;  %v365_v5 = vld [vmem:[%s406_s0] sm:$0xff] }
   0x3   :  { %v287_v6 = vpack.c.bf16 %v26_v4, %v25_v2  ;;  %280 = vmatprep.mubr.msk.f32.mxu0 %vm27_vm0, %v365_v5 }
   0x4   :  { %7 = vsyncpa [#allocation6], 0  ;;  %284 = vmatprep.subr.bf16.mxu0 %v283_v3  ;;  %v372_v7 = vld [vmem:[%s406_s0 + $0x8] sm:$0xff]  ;;  %vm16_vm1 = vcmask 1024   ;;  %v330_v8 = vmov -inf   ;;  %v331_v9 = vmov 0.0   ;;  %v138_v22 = vlaneseq }
   0x5   :  { %286 = vmatpush3.bf16.msra.mxu0 %v283_v3  ;;  %17 = vst.msk [vmem:[#allocation2] sm:$0x3] %vm16_vm1, %v330_v8  ;;  %18 = vst.msk [vmem:[#allocation3] sm:$0x3] %vm16_vm1, %v331_v9  ;;  %v332_v10 = vmov 0   ;;  %vm19_vm2 = vcmask 254976  }
   0x6   :  { %288 = vmatprep.subr.bf16.mxu0 %v287_v6  ;;  %297 = vset.pattern.permute.xlu1 %v332_v10  ;;  %20 = vst.msk [vmem:[#allocation4] sm:$0x3] %vm19_vm2, %v331_v9  ;;  %vm110_vm3 = vcmask 7168   ;;  %v333_v20 = vmov 1966171168   ;;  %v139_v28 = vshrl.u32 %v138_v22, 7 }
   0x7   :  { %296 = vset.pattern.permute.xlu0 %v332_v10  ;;  %v136_v21 = vunpack.c.l.s4 %v333_v20  ;;  %vm127_vm4 = vcmask 1041409   ;;  %s334_s0 = smov [#allocation5]  }
   0x8   :  { %v159_v37 = vsub.s32 0, %v139_v28  ;;  %s256_s1 = sshll.u32 %s334_s0, 4  ;;  %s257_s1 = int_to_ptr.vmem [resolvable:$true] %s256_s1 }
   0x9   :  { %290 = vmatpush3.bf16.msra.mxu0 %v287_v6  ;;  %v137_v27 = vunpack.c.0.s8 %v136_v21  ;;  %s306_s21 = scalar_lea.vmem %s257_s1, 32  ;;  %p311_p1 = scmp.lt.s32.totalorder %s257_s1, %s257_s1 }
   0xa   :  { %p307_p0 = scmp.ne.s32.totalorder %s257_s1, %s306_s21  ;;  %p312_p2 = scmp.lt.s32.totalorder %s306_s21, %s306_s21 }
   0xb   :  { %v140_v33 = vsub.s32 %v137_v27, %v139_v28 }
   0xc   :  { %281 = vmatmul.mubr.msk.f32.vlgmr.msra.gmra.mrb[0].mxu0 %vm27_vm0, %v372_v7  ;;  %v109_v31 = vld [vmem:[#allocation2] sm:$0x3]  ;;  %v173_v0 = vld [vmem:[#allocation3] sm:$0x3]  ;;  %p313_p3 = por %p312_p2, %p311_p1 }
   0xe   :  { %p314_p4 = pnand %p313_p3, %p307_p0 }
  0xdf   :  { %v282_v11 = vpop.f32.mrb[0].mxu0 }
  0xe0   :  { %v118_v12 = vsel %vm110_vm3, %v282_v11, -inf  ;;  %v100_v13 = vpop.f32.mrb[1].mxu0 }
  0xe1   :  { %v119_v14 = vrot.slane %v118_v12, 4  ;;  %v111_v15 = vsel %vm110_vm3, %v100_v13, -inf }
  0xe2   :  { %v112_v16 = vrot.slane %v111_v15, 4 }
  0xe3   :  { %v120_v17 = vmax.f32 %v118_v12, %v119_v14 }
  0xe4   :  { %v113_v18 = vmax.f32 %v111_v15, %v112_v16 }
  0xe5   :  { %v121_v19 = vrot.slane %v120_v17, 2 }
  0xe6   :  { %v114_v23 = vrot.slane %v113_v18, 2 }
  0xe7   :  { %v122_v24 = vmax.f32 %v120_v17, %v121_v19 }
  0xe8   :  { %v115_v25 = vmax.f32 %v113_v18, %v114_v23 }
  0xe9   :  { %v123_v26 = vrot.slane %v122_v24, 1 }
  0xea   :  { %v116_v29 = vrot.slane %v115_v25, 1 }
  0xeb   :  { %v124_v30 = vmax.f32 %v122_v24, %v123_v26 }
  0xec   :  { %v117_v32 = vmax.f32 %v115_v25, %v116_v29  ;;  %v196_v25 = vld [vmem:[#allocation4] sm:$0x3] }
  0xee   :  { %v128_v34 = vsel %vm127_vm4, %v124_v30, %v117_v32 }
  0xef   :  { %v130_v35 = vmax.f32 %v109_v31, %v128_v34 }
  0xf1   :  { %v141_v36 = vrot.slane %v130_v35, %v140_v33  ;;  %236 = vst.msk [vmem:[#allocation2] sm:$0x3] %vm16_vm1, %v130_v35  ;;  %v131_v38 = vsub.f32 %v109_v31, %v130_v35 }
  0xf3   :  { %v142_v39 = vcombine.high %v141_v36, %v141_v36  ;;  %v149_v40 = vrot.slane %v141_v36, %v140_v33  ;;  %v132_v41 = vmul.f32 1.442695, %v131_v38 }
  0xf5   :  { %v156_v42 = vrot.slane %v142_v39, %v140_v33  ;;  %v160_v43 = vrot.slane %v149_v40, %v159_v37  ;;  %298 = vpow2.f32 %v132_v41 }
  0xf7   :  { %v164_v44 = vrot.slane %v156_v42, %v159_v37  ;;  %v167_v45 = vsub.f32 %v100_v13, %v160_v43 }
  0xf9   :  { %v168_v46 = vsub.f32 %v282_v11, %v164_v44  ;;  %v169_v47 = vmul.f32 1.442695, %v167_v45 }
  0xfb   :  { %300 = vpow2.f32 %v169_v47  ;;  %v171_v48 = vmul.f32 1.442695, %v168_v46 }
  0xfd   :  { %302 = vpow2.f32 %v171_v48 }
  0xff   :  { %v299_v49 = vpop.eup %298 }
 0x100   :  { %199 = vperm.xlu1 %297, %v299_v49   ;;  %v174_v3 = vmul.f32 %v299_v49, %v173_v0 }
 0x105   :  { %v301_v50 = vpop.eup %300 }
 0x106   :  { %v175_v51 = vsel %vm110_vm3, %v301_v50, 0.0  ;;  %205 = vperm.xlu0 %296, %v301_v50  }
 0x107   :  { %v303_v52 = vpop.eup %302  ;;  %v176_v53 = vrot.slane %v175_v51, 4 }
 0x108   :  { %v182_v54 = vsel %vm110_vm3, %v303_v52, 0.0 }
 0x109   :  { %v177_v55 = vadd.f32 %v176_v53, %v175_v51  ;;  %v183_v56 = vrot.slane %v182_v54, 4 }
 0x10a   :  { %210 = vperm.xlu0 %296, %v303_v52  }
 0x10b   :  { %v178_v57 = vrot.slane %v177_v55, 2  ;;  %v184_v58 = vadd.f32 %v183_v56, %v182_v54 }
 0x10d   :  { %v179_v59 = vadd.f32 %v178_v57, %v177_v55  ;;  %v185_v60 = vrot.slane %v184_v58, 2 }
 0x10f   :  { %v180_v61 = vrot.slane %v179_v59, 1  ;;  %v186_v62 = vadd.f32 %v185_v60, %v184_v58 }
 0x111   :  { %v187_v63 = vrot.slane %v186_v62, 1  ;;  %v181_v1 = vadd.f32 %v180_v61, %v179_v59 }
 0x113   :  { %v188_v2 = vadd.f32 %v187_v63, %v186_v62 }
 0x115   :  { %v191_v4 = vsel %vm127_vm4, %v188_v2, %v181_v1 }
 0x116   :  { %v193_v6 = vadd.f32 %v191_v4, %v174_v3 }
 0x118   :  { %195 = vst.msk [vmem:[#allocation3] sm:$0x3] %vm16_vm1, %v193_v6 }
 0x11f   :  { %v240_v8 = vld [vmem:[#allocation3] sm:$0x3] }
 0x120   :  { %304 = vrcp.f32 %v240_v8 }
 0x12a   :  { %v305_v9 = vpop.eup %304 }
 0x12b   :  { %245 = vperm.xlu1 %297, %v305_v9  }
 0x17f   :  { %v200_v26 = vpop.permute.xlu1 %199 }
 0x180   :  { %v202_v29 = vmul.f32 %v200_v26, %v196_v25 }
 0x185   :  { %v206_v10 = vpop.permute.xlu0 %205 }
 0x186   :  { %v213_v11 = vmul.f32 %v206_v10, %v365_v5 }
 0x188   :  { %v215_v12 = vsel %vm27_vm0, %v213_v11, 0.0 }
 0x189   :  { %v216_v13 = vrot.slane %v215_v12, 4  ;;  %v211_v14 = vpop.permute.xlu0 %210 }
 0x18a   :  { %v214_v15 = vmul.f32 %v211_v14, %v372_v7 }
 0x18b   :  { %v217_v16 = vadd.f32 %v216_v13, %v215_v12 }
 0x18c   :  { %v222_v17 = vsel %vm27_vm0, %v214_v15, 0.0 }
 0x18d   :  { %v218_v18 = vrot.slane %v217_v16, 2  ;;  %v223_v19 = vrot.slane %v222_v17, 4 }
 0x18f   :  { %v219_v20 = vadd.f32 %v218_v18, %v217_v16  ;;  %v224_v21 = vadd.f32 %v223_v19, %v222_v17 }
 0x191   :  { %v225_v22 = vrot.slane %v224_v21, 2  ;;  %v220_v23 = vrot.slane %v219_v20, 1 }
 0x193   :  { %v226_v24 = vadd.f32 %v225_v22, %v224_v21  ;;  %v221_v5 = vadd.f32 %v220_v23, %v219_v20 }
 0x195   :  { %v227_v27 = vrot.slane %v226_v24, 1 }
 0x197   :  { %v228_v28 = vadd.f32 %v227_v27, %v226_v24 }
 0x199   :  { %v231_v30 = vsel %vm127_vm4, %v228_v28, %v221_v5 }
 0x19a   :  { %v233_v31 = vadd.f32 %v231_v30, %v202_v29 }
 0x19c   :  { %235 = vst.msk [vmem:[#allocation4] sm:$0x3] %vm19_vm2, %v233_v31 }
 0x1a3   :  { %v242_v7 = vld [vmem:[#allocation4] sm:$0x3] }
 0x1aa   :  { %v246_v32 = vpop.permute.xlu1 %245 }
 0x1ab   :  { %v248_v33 = vmul.f32 %v246_v32, %v242_v7 }
 0x1ad   :  { %249 = vst.msk [vmem:[#allocation5] sm:$0x3] %vm19_vm2, %v248_v33 }
 0x1ae   :  { %317 = shalt.err (!%p314_p4)
}
 0x1af   :  { %s318_s24 = scalar_lea.hbm %s408_s2, 32 }
 0x1b0   :  { %p319_p5 = scmp.ne.s32.totalorder %s408_s2, %s318_s24  ;;  %p322_p6 = scmp.lt.u32.totalorder %s318_s24, %s408_s2 }
 0x1b2   :  { %p324_p7 = pnand %p322_p6, %p319_p5 }
 0x1b4   :  { %327 = shalt.err (!%p324_p7)
}
 0x1b5   :  { %259 = dma.vmem_to_hbm [thread:$0]  %s257_s1, 32, %s408_s2, [#allocation6]  }
 0x1b6   :  { %328 = dma.done.wait [#allocation6], 32  }
 0x1b7   :  { %329 = vsyncadd [#allocation6], 4294967264 }
 0x1b8   :  { %263 = vsyncpa [#allocation6], 1 }

</bundles_post_ra>
